<compile_context>
chip_gen: v5e
topology: v5e:2x2
jax: 0.10.0
libtpu: 0.0.40
codegen_flags: <defaults>
</compile_context>

<pallas_src>
import jax
import jax.numpy as jnp
from jax.experimental import pallas as pl
from jax.experimental.pallas import tpu as pltpu

# ----------------------------- sizes ---------------------------------------
B, C, H_IMG, W_IMG = 2, 4, 16, 16
D = C * H_IMG * W_IMG          # 1024
HID = 32                       # hidden width
LAT = 16                       # latent width
B_PAD = 8                      # batch padded to a full sublane group
LANE = 128                     # lane width (padded mu|sigma slab)


def _softplus(x):
    # numerically-stable softplus (VPU + EUP)
    return jnp.maximum(x, 0.0) + jnp.log1p(jnp.exp(-jnp.abs(x)))


# --------------------------- fused kernel -----------------------------------
def vae_fused_kernel(x_ref, eps_ref, w1_ref, wms_ref, w3_ref, w4_ref, bias_ref,
                     xr_ref, ms_ref):
    # ---------------- encoder ----------------
    b1 = bias_ref[0:1, 0:HID]                                      # [1, HID]
    h = jnp.dot(x_ref[...], w1_ref[...],
                preferred_element_type=jnp.float32) + b1
    h = jnp.maximum(h, 0.0)                                        # [B_PAD, HID] f32

    # fused mu|sigma projection, zero-padded to 128 lanes (lane-dense output)
    bms = bias_ref[1:2, 0:LANE]                                    # [1, LANE]
    musig = jnp.dot(h.astype(jnp.bfloat16), wms_ref[...],
                    preferred_element_type=jnp.float32) + bms      # [B_PAD, LANE]

    lane = jax.lax.broadcasted_iota(jnp.int32, (B_PAD, LANE), 1)
    is_mu = lane < LAT
    is_sig = jnp.logical_and(lane >= LAT, lane < 2 * LAT)
    sp = _softplus(musig)

    # packed output slab: mu in lanes [0,16), sigma in [16,32), zeros beyond.
    ms_ref[...] = jnp.where(is_sig, sp, musig)                     # unmasked store

    # reparameterization, kept 128-lane padded:
    #   eps_ref carries eps in lanes [16,32) (aligned with sigma), zeros elsewhere,
    #   so zz = mu (lanes 0:16) + sigma*eps (lanes 16:32), zeros elsewhere.
    zz = jnp.where(is_mu, musig, 0.0) + jnp.where(is_sig, sp, 0.0) * eps_ref[...]

    # ---------------- decoder ----------------
    # w3_ref holds W3 duplicated in rows [0,16) and [16,32) (zeros elsewhere),
    # so contracting the padded zz against it yields exactly z @ W3.
    b3 = bias_ref[2:3, 0:HID]                                      # [1, HID]
    h2 = jnp.dot(zz.astype(jnp.bfloat16), w3_ref[...],
                 preferred_element_type=jnp.float32) + b3
    h2 = jnp.maximum(h2, 0.0)                                      # [B_PAD, HID]

    b4 = bias_ref[3:4, :]                                          # [1, D]
    pre = jnp.dot(h2.astype(jnp.bfloat16), w4_ref[...],
                  preferred_element_type=jnp.float32) + b4         # [B_PAD, D]
    # numerically-stable sigmoid via tanh (EUP), no inf intermediates
    xr_ref[...] = 0.5 * jnp.tanh(0.5 * pre) + 0.5


# ----------------------------- wrappers --------------------------------------
_VMEM = pl.BlockSpec(memory_space=pltpu.MemorySpace.VMEM)

_COST = pl.CostEstimate(
    flops=2 * B_PAD * (D * HID + HID * LANE + LANE * HID + HID * D),
    transcendentals=B_PAD * (2 * LANE + D),
    bytes_accessed=(B_PAD * D * 2 + B_PAD * LANE * 4            # x, eps
                    + D * HID * 2 + HID * LANE * 2              # W1, Wms
                    + LANE * HID * 2 + HID * D * 2              # W3d, W4
                    + 4 * D * 4                                  # bias pack
                    + B_PAD * D * 4 + B_PAD * LANE * 4),         # outputs
)


def _vae_call(x_pad, eps_pad, w1, wms, w3d, w4, bias_pack):
    xr_pad, ms_pad = pl.pallas_call(
        vae_fused_kernel,
        out_shape=(
            jax.ShapeDtypeStruct((B_PAD, D), jnp.float32),       # x_recon (padded)
            jax.ShapeDtypeStruct((B_PAD, LANE), jnp.float32),    # mu|sigma slab
        ),
        in_specs=[_VMEM] * 7,
        out_specs=(_VMEM, _VMEM),
        cost_estimate=_COST,
    )(x_pad, eps_pad, w1, wms, w3d, w4, bias_pack)
    return xr_pad, ms_pad


def pack_params(w1, b1, wmu, bmu, wsig, bsig, w3, b3, w4, b4):
    """One-time packing: fuse Wmu|Wsig into a 128-lane-padded matrix, duplicate
    W3 for the padded-z contraction, consolidate all biases into one [4, D]
    f32 buffer, and cast matmul operands to bf16 (f32 accumulation in-kernel)."""
    wms = jnp.zeros((HID, LANE), jnp.float32)
    wms = wms.at[:, :LAT].set(wmu).at[:, LAT:2 * LAT].set(wsig)
    w3d = jnp.zeros((LANE, HID), jnp.float32)
    w3d = w3d.at[:LAT, :].set(w3).at[LAT:2 * LAT, :].set(w3)
    bias = jnp.zeros((4, D), jnp.float32)
    bias = (bias.at[0, :HID].set(b1)
                .at[1, :LAT].set(bmu)
                .at[1, LAT:2 * LAT].set(bsig)
                .at[2, :HID].set(b3)
                .at[3, :].set(b4))
    return (w1.astype(jnp.bfloat16), wms.astype(jnp.bfloat16),
            w3d.astype(jnp.bfloat16), w4.astype(jnp.bfloat16), bias)


@jax.jit
def simple_autoencoder_forward(x_nchw, packed, eps):
    w1, wms, w3d, w4, bias_pack = packed
    # glue: flatten NCHW -> [B, D] (same as torch .view(B, -1)), pad batch to 8
    x2d = x_nchw.reshape(x_nchw.shape[0], -1)
    x_pad = jnp.zeros((B_PAD, D), jnp.bfloat16).at[:B, :].set(
        x2d.astype(jnp.bfloat16))
    # eps placed in lanes [16, 32) to line up with the sigma lanes of musig
    eps_pad = jnp.zeros((B_PAD, LANE), jnp.float32).at[:B, LAT:2 * LAT].set(eps)
    xr_pad, ms_pad = _vae_call(x_pad, eps_pad, w1, wms, w3d, w4, bias_pack)
    x_recon = xr_pad[:B]
    mu = ms_pad[:B, :LAT]
    sigma = ms_pad[:B, LAT:2 * LAT]
    return x_recon, mu, sigma


# ----------------------------- main ------------------------------------------
if __name__ == "__main__":
    key = jax.random.PRNGKey(0)
    keys = jax.random.split(key, 12)

    # deterministic synthetic parameters
    w1   = 0.02 * jax.random.normal(keys[0], (D, HID),   jnp.float32)
    b1   = 0.01 * jax.random.normal(keys[1], (HID,),     jnp.float32)
    wmu  = 0.02 * jax.random.normal(keys[2], (HID, LAT), jnp.float32)
    bmu  = 0.01 * jax.random.normal(keys[3], (LAT,),     jnp.float32)
    wsig = 0.02 * jax.random.normal(keys[4], (HID, LAT), jnp.float32)
    bsig = 0.01 * jax.random.normal(keys[5], (LAT,),     jnp.float32)
    w3   = 0.02 * jax.random.normal(keys[6], (LAT, HID), jnp.float32)
    b3   = 0.01 * jax.random.normal(keys[7], (HID,),     jnp.float32)
    w4   = 0.02 * jax.random.normal(keys[8], (HID, D),   jnp.float32)
    b4   = 0.01 * jax.random.normal(keys[9], (D,),       jnp.float32)

    packed = pack_params(w1, b1, wmu, bmu, wsig, bsig, w3, b3, w4, b4)

    # deterministic input (NCHW, like PyTorch) and reparameterization noise
    x = jax.random.normal(keys[10], (B, C, H_IMG, W_IMG), jnp.float32)
    eps = jax.random.normal(keys[11], (B, LAT), jnp.float32)

    x_recon, mu, sigma = simple_autoencoder_forward(x, packed, eps)
    jax.block_until_ready((x_recon, mu, sigma))

    # correctness check vs. plain JAX (same bf16 matmul operands as the kernel)
    x2d = x.reshape(B, -1)

    def dotf(a, b):
        return jnp.dot(a.astype(jnp.bfloat16), b.astype(jnp.bfloat16),
                       preferred_element_type=jnp.float32)

    h_r  = jnp.maximum(dotf(x2d, w1) + b1, 0.0)
    mu_r = dotf(h_r, wmu) + bmu
    sg_r = jax.nn.softplus(dotf(h_r, wsig) + bsig)
    z_r  = mu_r + sg_r * eps
    h2_r = jnp.maximum(dotf(z_r, w3) + b3, 0.0)
    xr_r = jax.nn.sigmoid(dotf(h2_r, w4) + b4)

    assert jnp.allclose(mu, mu_r, atol=2e-3), "mu mismatch"
    assert jnp.allclose(sigma, sg_r, atol=2e-3), "sigma mismatch"
    assert jnp.allclose(x_recon, xr_r, atol=2e-3), "x_recon mismatch"

    print("KERNEL_OK")
</pallas_src>

<mosaic_0001>
module attributes {stable_mosaic.version = 11 : i64} {
  func.func @vae_fused_kernel(%arg0: memref<8x1024xbf16, #tpu.memory_space<vmem>>, %arg1: memref<8x128xf32, #tpu.memory_space<vmem>>, %arg2: memref<1024x32xbf16, #tpu.memory_space<vmem>>, %arg3: memref<32x128xbf16, #tpu.memory_space<vmem>>, %arg4: memref<128x32xbf16, #tpu.memory_space<vmem>>, %arg5: memref<32x1024xbf16, #tpu.memory_space<vmem>>, %arg6: memref<4x1024xf32, #tpu.memory_space<vmem>>, %arg7: memref<8x1024xf32, #tpu.memory_space<vmem>>, %arg8: memref<8x128xf32, #tpu.memory_space<vmem>>) attributes {dimension_semantics = [], scalar_prefetch = 0 : i64, scratch_operands = 0 : i64, tpu.core_type = #tpu.core_type<tc>} {
    %c0 = arith.constant 0 : index
    %c0_0 = arith.constant 0 : index
    %0 = vector.load %arg6[%c0, %c0_0] : memref<4x1024xf32, #tpu.memory_space<vmem>>, vector<1x32xf32>
    %c0_1 = arith.constant 0 : index
    %c0_2 = arith.constant 0 : index
    %1 = vector.load %arg0[%c0_1, %c0_2] : memref<8x1024xbf16, #tpu.memory_space<vmem>>, vector<8x1024xbf16>
    %c0_3 = arith.constant 0 : index
    %c0_4 = arith.constant 0 : index
    %2 = vector.load %arg2[%c0_3, %c0_4] : memref<1024x32xbf16, #tpu.memory_space<vmem>>, vector<1024x32xbf16>
    %cst = arith.constant dense<0.000000e+00> : vector<8x32xf32>
    %3 = tpu.matmul %1, %2, %cst {dimension_numbers = #tpu.dot_dimension_numbers<[1], [0], [0], [1], [0, 0, 1, 1], [], []>} : vector<8x1024xbf16>, vector<1024x32xbf16>, vector<8x32xf32> -> vector<8x32xf32>
    %4 = vector.broadcast %0 : vector<1x32xf32> to vector<8x32xf32>
    %5 = arith.addf %3, %4 : vector<8x32xf32>
    %cst_5 = arith.constant 0.000000e+00 : f32
    %6 = vector.broadcast %cst_5 : f32 to vector<8x32xf32>
    %7 = arith.maximumf %5, %6 : vector<8x32xf32>
    %c1 = arith.constant 1 : index
    %c0_6 = arith.constant 0 : index
    %8 = vector.load %arg6[%c1, %c0_6] : memref<4x1024xf32, #tpu.memory_space<vmem>>, vector<1x128xf32>
    %9 = arith.truncf %7 : vector<8x32xf32> to vector<8x32xbf16>
    %c0_7 = arith.constant 0 : index
    %c0_8 = arith.constant 0 : index
    %10 = vector.load %arg3[%c0_7, %c0_8] : memref<32x128xbf16, #tpu.memory_space<vmem>>, vector<32x128xbf16>
    %cst_9 = arith.constant dense<0.000000e+00> : vector<8x128xf32>
    %11 = tpu.matmul %9, %10, %cst_9 {dimension_numbers = #tpu.dot_dimension_numbers<[1], [0], [0], [1], [0, 0, 1, 1], [], []>} : vector<8x32xbf16>, vector<32x128xbf16>, vector<8x128xf32> -> vector<8x128xf32>
    %12 = vector.broadcast %8 : vector<1x128xf32> to vector<8x128xf32>
    %13 = arith.addf %11, %12 : vector<8x128xf32>
    %14 = tpu.iota {dimensions = array<i32: 1>} : vector<8x128xi32>
    %c16_i32 = arith.constant 16 : i32
    %15 = vector.broadcast %c16_i32 : i32 to vector<8x128xi32>
    %16 = arith.cmpi slt, %14, %15 : vector<8x128xi32>
    %c16_i32_10 = arith.constant 16 : i32
    %17 = vector.broadcast %c16_i32_10 : i32 to vector<8x128xi32>
    %18 = arith.cmpi sge, %14, %17 : vector<8x128xi32>
    %c32_i32 = arith.constant 32 : i32
    %19 = vector.broadcast %c32_i32 : i32 to vector<8x128xi32>
    %20 = arith.cmpi slt, %14, %19 : vector<8x128xi32>
    %21 = arith.andi %18, %20 : vector<8x128xi1>
    %cst_11 = arith.constant 0.000000e+00 : f32
    %22 = vector.broadcast %cst_11 : f32 to vector<8x128xf32>
    %23 = arith.maximumf %13, %22 : vector<8x128xf32>
    %24 = math.absf %13 : vector<8x128xf32>
    %cst_12 = arith.constant 0.000000e+00 : f32
    %25 = vector.broadcast %cst_12 : f32 to vector<8x128xf32>
    %26 = arith.subf %25, %24 : vector<8x128xf32>
    %27 = math.exp %26 : vector<8x128xf32>
    %28 = math.log1p %27 : vector<8x128xf32>
    %29 = arith.addf %23, %28 : vector<8x128xf32>
    %30 = arith.select %21, %29, %13 : vector<8x128xi1>, vector<8x128xf32>
    %c0_13 = arith.constant 0 : index
    %c0_14 = arith.constant 0 : index
    %31 = vector.load %arg8[%c0_13, %c0_14] : memref<8x128xf32, #tpu.memory_space<vmem>>, vector<8x128xf32>
    tpu.vector_store %arg8[%c0_13, %c0_14], %30 {strides = array<i32>} : memref<8x128xf32, #tpu.memory_space<vmem>>, vector<8x128xf32>,
    %cst_15 = arith.constant 0.000000e+00 : f32
    %32 = vector.broadcast %cst_15 : f32 to vector<8x128xf32>
    %33 = arith.select %16, %13, %32 : vector<8x128xi1>, vector<8x128xf32>
    %cst_16 = arith.constant 0.000000e+00 : f32
    %34 = vector.broadcast %cst_16 : f32 to vector<8x128xf32>
    %35 = arith.select %21, %29, %34 : vector<8x128xi1>, vector<8x128xf32>
    %c0_17 = arith.constant 0 : index
    %c0_18 = arith.constant 0 : index
    %36 = vector.load %arg1[%c0_17, %c0_18] : memref<8x128xf32, #tpu.memory_space<vmem>>, vector<8x128xf32>
    %37 = arith.mulf %35, %36 : vector<8x128xf32>
    %38 = arith.addf %33, %37 : vector<8x128xf32>
    %c2 = arith.constant 2 : index
    %c0_19 = arith.constant 0 : index
    %39 = vector.load %arg6[%c2, %c0_19] : memref<4x1024xf32, #tpu.memory_space<vmem>>, vector<1x32xf32>
    %40 = arith.truncf %38 : vector<8x128xf32> to vector<8x128xbf16>
    %c0_20 = arith.constant 0 : index
    %c0_21 = arith.constant 0 : index
    %41 = vector.load %arg4[%c0_20, %c0_21] : memref<128x32xbf16, #tpu.memory_space<vmem>>, vector<128x32xbf16>
    %cst_22 = arith.constant dense<0.000000e+00> : vector<8x32xf32>
    %42 = tpu.matmul %40, %41, %cst_22 {dimension_numbers = #tpu.dot_dimension_numbers<[1], [0], [0], [1], [0, 0, 1, 1], [], []>} : vector<8x128xbf16>, vector<128x32xbf16>, vector<8x32xf32> -> vector<8x32xf32>
    %43 = vector.broadcast %39 : vector<1x32xf32> to vector<8x32xf32>
    %44 = arith.addf %42, %43 : vector<8x32xf32>
    %cst_23 = arith.constant 0.000000e+00 : f32
    %45 = vector.broadcast %cst_23 : f32 to vector<8x32xf32>
    %46 = arith.maximumf %44, %45 : vector<8x32xf32>
    %c3 = arith.constant 3 : index
    %c0_24 = arith.constant 0 : index
    %47 = vector.load %arg6[%c3, %c0_24] : memref<4x1024xf32, #tpu.memory_space<vmem>>, vector<1x1024xf32>
    %48 = arith.truncf %46 : vector<8x32xf32> to vector<8x32xbf16>
    %c0_25 = arith.constant 0 : index
    %c0_26 = arith.constant 0 : index
    %49 = vector.load %arg5[%c0_25, %c0_26] : memref<32x1024xbf16, #tpu.memory_space<vmem>>, vector<32x1024xbf16>
    %cst_27 = arith.constant dense<0.000000e+00> : vector<8x1024xf32>
    %50 = tpu.matmul %48, %49, %cst_27 {dimension_numbers = #tpu.dot_dimension_numbers<[1], [0], [0], [1], [0, 0, 1, 1], [], []>} : vector<8x32xbf16>, vector<32x1024xbf16>, vector<8x1024xf32> -> vector<8x1024xf32>
    %51 = vector.broadcast %47 : vector<1x1024xf32> to vector<8x1024xf32>
    %52 = arith.addf %50, %51 : vector<8x1024xf32>
    %cst_28 = arith.constant 5.000000e-01 : f32
    %53 = vector.broadcast %cst_28 : f32 to vector<8x1024xf32>
    %54 = arith.mulf %53, %52 : vector<8x1024xf32>
    %55 = math.tanh %54 : vector<8x1024xf32>
    %cst_29 = arith.constant 5.000000e-01 : f32
    %56 = vector.broadcast %cst_29 : f32 to vector<8x1024xf32>
    %57 = arith.mulf %56, %55 : vector<8x1024xf32>
    %cst_30 = arith.constant 5.000000e-01 : f32
    %58 = vector.broadcast %cst_30 : f32 to vector<8x1024xf32>
    %59 = arith.addf %57, %58 : vector<8x1024xf32>
    %c0_31 = arith.constant 0 : index
    %c0_32 = arith.constant 0 : index
    %60 = vector.load %arg7[%c0_31, %c0_32] : memref<8x1024xf32, #tpu.memory_space<vmem>>, vector<8x1024xf32>
    tpu.vector_store %arg7[%c0_31, %c0_32], %59 {strides = array<i32>} : memref<8x1024xf32, #tpu.memory_space<vmem>>, vector<8x1024xf32>,
    return
  }
}

</mosaic_0001>

<bundles_post_ra>
// kernel: simple_autoencoder_forward.1
= control target key start
LH: loop header
LB: loop body
LE: loop exit
PB: predicated region body
PF: predicated region fallthrough
CT: control target
= control target key end

     0   :  { %vm699_vm0 = vcmask 261120   ;;  %s2015_s2 = inlined_call_operand.vmem [shape: bf16[1024,32], index: 2, kind: input, shape index: {}]   ;;  %s2016_s6 = inlined_call_operand.vmem [shape: f32[4,1024], index: 6, kind: input, shape index: {}]   ;;  %s2017_s0 = inlined_call_operand.vmem [shape: bf16[8,1024], index: 0, kind: input, shape index: {}]   ;;  %s2018_s3 = inlined_call_operand.vmem [shape: bf16[32,128], index: 3, kind: input, shape index: {}]   ;;  %s2019_s4 = inlined_call_operand.vmem [shape: bf16[128,32], index: 4, kind: input, shape index: {}]   ;;  %s2020_s5 = inlined_call_operand.vmem [shape: bf16[32,1024], index: 5, kind: input, shape index: {}]   ;;  %s2021_s1 = inlined_call_operand.vmem [shape: f32[8,128], index: 1, kind: input, shape index: {}]   ;;  %s2022_s8 = inlined_call_operand.vmem [shape: f32[8,128], index: 8, kind: output, shape index: {1}]   ;;  %s2023_s7 = inlined_call_operand.vmem [shape: f32[8,1024], index: 7, kind: output, shape index: {0}]  }
   0x1   :  { %v1473_v0 = vld [vmem:[%s2015_s2 + $0x38] sm:$0xff]  ;;  %v1472_v4 = vld [vmem:[%s2015_s2 + $0x30] sm:$0xff]  ;;  %v1471_v8 = vld [vmem:[%s2015_s2 + $0x28] sm:$0xff] }
   0x2   :  { %v1481_v1 = vld [vmem:[%s2015_s2 + $0x78] sm:$0xff]  ;;  %575 = vmatpush.bf16.msra.mxu0 %v1473_v0  ;;  %v1480_v5 = vld [vmem:[%s2015_s2 + $0x70] sm:$0xff]  ;;  %v1479_v9 = vld [vmem:[%s2015_s2 + $0x68] sm:$0xff] }
   0x3   :  { %v1489_v2 = vld [vmem:[%s2015_s2 + $0xb8] sm:$0xff]  ;;  %588 = vmatpush.bf16.msra.mxu1 %v1481_v1  ;;  %v1488_v6 = vld [vmem:[%s2015_s2 + $0xb0] sm:$0xff]  ;;  %v1487_v10 = vld [vmem:[%s2015_s2 + $0xa8] sm:$0xff] }
   0x4   :  { %v1497_v3 = vld [vmem:[%s2015_s2 + $0xf8] sm:$0xff]  ;;  %601 = vmatpush.bf16.msra.mxu2 %v1489_v2  ;;  %v1496_v7 = vld [vmem:[%s2015_s2 + $0xf0] sm:$0xff]  ;;  %v1495_v11 = vld [vmem:[%s2015_s2 + $0xe8] sm:$0xff] }
   0x5   :  { %614 = vmatpush.bf16.msra.mxu3 %v1497_v3  ;;  %v1470_v12 = vld [vmem:[%s2015_s2 + $0x20] sm:$0xff]  ;;  %v1469_v16 = vld [vmem:[%s2015_s2 + $0x18] sm:$0xff]  ;;  %v1468_v20 = vld [vmem:[%s2015_s2 + $0x10] sm:$0xff] }
   0x6   :  { %576 = vmatpush.bf16.msra.mxu0 %v1472_v4  ;;  %v1478_v13 = vld [vmem:[%s2015_s2 + $0x60] sm:$0xff]  ;;  %v1477_v17 = vld [vmem:[%s2015_s2 + $0x58] sm:$0xff]  ;;  %v1476_v21 = vld [vmem:[%s2015_s2 + $0x50] sm:$0xff] }
   0x7   :  { %589 = vmatpush.bf16.msra.mxu1 %v1480_v5  ;;  %v1486_v14 = vld [vmem:[%s2015_s2 + $0xa0] sm:$0xff]  ;;  %v1485_v18 = vld [vmem:[%s2015_s2 + $0x98] sm:$0xff]  ;;  %v1484_v22 = vld [vmem:[%s2015_s2 + $0x90] sm:$0xff] }
   0x8   :  { %602 = vmatpush.bf16.msra.mxu2 %v1488_v6  ;;  %v1494_v15 = vld [vmem:[%s2015_s2 + $0xe0] sm:$0xff]  ;;  %v1493_v19 = vld [vmem:[%s2015_s2 + $0xd8] sm:$0xff]  ;;  %v1492_v23 = vld [vmem:[%s2015_s2 + $0xd0] sm:$0xff] }
   0x9   :  { %615 = vmatpush.bf16.msra.mxu3 %v1496_v7  ;;  %v1467_v24 = vld [vmem:[%s2015_s2 + $0x8] sm:$0xff]  ;;  %v30_v29 = vld [vmem:[%s2017_s0] sm:$0xff]  ;;  %v1505_v38 = vld [vmem:[%s2015_s2 + $0x138] sm:$0xff] }
   0xa   :  { %577 = vmatpush.bf16.msra.mxu0 %v1471_v8  ;;  %v1475_v25 = vld [vmem:[%s2015_s2 + $0x48] sm:$0xff]  ;;  %v1466_v30 = vld [vmem:[%s2015_s2] sm:$0xff]  ;;  %v167_v33 = vunpack.c.l.b16 %v30_v29  ;;  %v168_v37 = vunpack.c.h.b16 %v30_v29  ;;  %v1513_v39 = vld [vmem:[%s2015_s2 + $0x178] sm:$0xff] }
   0xb   :  { %590 = vmatpush.bf16.msra.mxu1 %v1479_v9  ;;  %v1483_v26 = vld [vmem:[%s2015_s2 + $0x88] sm:$0xff]  ;;  %v1474_v31 = vld [vmem:[%s2015_s2 + $0x40] sm:$0xff]  ;;  %v1521_v40 = vld [vmem:[%s2015_s2 + $0x1b8] sm:$0xff] }
   0xc   :  { %603 = vmatpush.bf16.msra.mxu2 %v1487_v10  ;;  %v1491_v27 = vld [vmem:[%s2015_s2 + $0xc8] sm:$0xff]  ;;  %v1482_v34 = vld [vmem:[%s2015_s2 + $0x80] sm:$0xff]  ;;  %v1529_v41 = vld [vmem:[%s2015_s2 + $0x1f8] sm:$0xff]  ;;  %v175_v43 = vpack.c.b16 %v167_v33, %v167_v33  ;;  %v176_v45 = vpack.c.b16 %v168_v37, %v168_v37 }
   0xd   :  { %616 = vmatpush.bf16.msra.mxu3 %v1495_v11  ;;  %v31_v28 = vld [vmem:[%s2017_s0 + $0x8] sm:$0xff]  ;;  %v1490_v35 = vld [vmem:[%s2015_s2 + $0xc0] sm:$0xff]  ;;  %v1504_v46 = vld [vmem:[%s2015_s2 + $0x130] sm:$0xff] }
   0xe   :  { %578 = vmatpush.bf16.msra.mxu0 %v1470_v12  ;;  %v169_v32 = vunpack.c.l.b16 %v31_v28  ;;  %v170_v36 = vunpack.c.h.b16 %v31_v28  ;;  %v1512_v47 = vld [vmem:[%s2015_s2 + $0x170] sm:$0xff]  ;;  %v1503_v50 = vld [vmem:[%s2015_s2 + $0x128] sm:$0xff]  ;;  %v1502_v54 = vld [vmem:[%s2015_s2 + $0x120] sm:$0xff] }
   0xf   :  { %591 = vmatpush.bf16.msra.mxu1 %v1478_v13  ;;  %v1520_v48 = vld [vmem:[%s2015_s2 + $0x1b0] sm:$0xff]  ;;  %v1511_v51 = vld [vmem:[%s2015_s2 + $0x168] sm:$0xff]  ;;  %v1510_v55 = vld [vmem:[%s2015_s2 + $0x160] sm:$0xff] }
  0x10   :  { %604 = vmatpush.bf16.msra.mxu2 %v1486_v14  ;;  %v177_v42 = vpack.c.b16 %v169_v32, %v169_v32  ;;  %v178_v44 = vpack.c.b16 %v170_v36, %v170_v36  ;;  %v1528_v49 = vld [vmem:[%s2015_s2 + $0x1f0] sm:$0xff]  ;;  %v1519_v52 = vld [vmem:[%s2015_s2 + $0x1a8] sm:$0xff]  ;;  %v1518_v56 = vld [vmem:[%s2015_s2 + $0x1a0] sm:$0xff] }
  0x11   :  { %617 = vmatpush.bf16.msra.mxu3 %v1494_v15  ;;  %v1527_v53 = vld [vmem:[%s2015_s2 + $0x1e8] sm:$0xff]  ;;  %v1526_v57 = vld [vmem:[%s2015_s2 + $0x1e0] sm:$0xff]  ;;  %v1501_v58 = vld [vmem:[%s2015_s2 + $0x118] sm:$0xff] }
  0x12   :  { %579 = vmatpush.bf16.msra.mxu0 %v1469_v16  ;;  %v1509_v59 = vld [vmem:[%s2015_s2 + $0x158] sm:$0xff]  ;;  %v1500_v62 = vld [vmem:[%s2015_s2 + $0x110] sm:$0xff]  ;;  %v1499_v2 = vld [vmem:[%s2015_s2 + $0x108] sm:$0xff] }
  0x13   :  { %592 = vmatpush.bf16.msra.mxu1 %v1477_v17  ;;  %v1517_v60 = vld [vmem:[%s2015_s2 + $0x198] sm:$0xff]  ;;  %v1508_v63 = vld [vmem:[%s2015_s2 + $0x150] sm:$0xff]  ;;  %v1507_v3 = vld [vmem:[%s2015_s2 + $0x148] sm:$0xff] }
  0x14   :  { %605 = vmatpush.bf16.msra.mxu2 %v1485_v18  ;;  %v1525_v61 = vld [vmem:[%s2015_s2 + $0x1d8] sm:$0xff]  ;;  %v1516_v0 = vld [vmem:[%s2015_s2 + $0x190] sm:$0xff]  ;;  %v1515_v5 = vld [vmem:[%s2015_s2 + $0x188] sm:$0xff] }
  0x15   :  { %618 = vmatpush.bf16.msra.mxu3 %v1493_v19  ;;  %v1524_v1 = vld [vmem:[%s2015_s2 + $0x1d0] sm:$0xff]  ;;  %v1523_v6 = vld [vmem:[%s2015_s2 + $0x1c8] sm:$0xff]  ;;  %v33_v7 = vld [vmem:[%s2017_s0 + $0x18] sm:$0xff] }
  0x16   :  { %580 = vmatpush.bf16.msra.mxu0 %v1468_v20  ;;  %v32_v4 = vld [vmem:[%s2017_s0 + $0x10] sm:$0xff]  ;;  %v1498_v10 = vld [vmem:[%s2015_s2 + $0x100] sm:$0xff]  ;;  %v173_v12 = vunpack.c.l.b16 %v33_v7  ;;  %v174_v13 = vunpack.c.h.b16 %v33_v7  ;;  %v1531_v20 = vld [vmem:[%s2018_s3 + $0x8] sm:$0xff] }
  0x17   :  { %593 = vmatpush.bf16.msra.mxu1 %v1476_v21  ;;  %v171_v8 = vunpack.c.l.b16 %v32_v4  ;;  %v172_v9 = vunpack.c.h.b16 %v32_v4  ;;  %v1506_v11 = vld [vmem:[%s2015_s2 + $0x140] sm:$0xff] }
  0x18   :  { %606 = vmatpush.bf16.msra.mxu2 %v1484_v22  ;;  %v1514_v14 = vld [vmem:[%s2015_s2 + $0x180] sm:$0xff]  ;;  %v181_v18 = vpack.c.b16 %v173_v12, %v173_v12  ;;  %v182_v19 = vpack.c.b16 %v174_v13, %v174_v13 }
  0x19   :  { %619 = vmatpush.bf16.msra.mxu3 %v1492_v23  ;;  %v1522_v15 = vld [vmem:[%s2015_s2 + $0x1c0] sm:$0xff]  ;;  %v179_v16 = vpack.c.b16 %v171_v8, %v171_v8  ;;  %v180_v17 = vpack.c.b16 %v172_v9, %v172_v9  ;;  %v716_v9 = vlaneseq }
  0x1a   :  { %581 = vmatpush.bf16.msra.mxu0 %v1467_v24  ;;  %v1556_v28 = vld [vmem:[%s2016_s6] ss:$0 sm:$0xff] }
  0x1b   :  { %594 = vmatpush.bf16.msra.mxu1 %v1475_v25 }
  0x1c   :  { %607 = vmatpush.bf16.msra.mxu2 %v1483_v26  ;;  %v1530_v26 = vld [vmem:[%s2018_s3] sm:$0xff] }
  0x1d   :  { %620 = vmatpush.bf16.msra.mxu3 %v1491_v27 }
  0x1e   :  { %582 = vmatpush.bf16.msra.mxu0 %v1466_v30 }
  0x1f   :  { %595 = vmatpush.bf16.msra.mxu1 %v1474_v31 }
  0x20   :  { %608 = vmatpush.bf16.msra.mxu2 %v1482_v34 }
  0x21   :  { %621 = vmatpush.bf16.msra.mxu3 %v1490_v35  ;;  %583 = vmatmul.bf16.vlgmr.msra.gmra.mxu0 %v175_v43 }
  0x22   :  { %627 = vmatpush.bf16.msrb.mxu0 %v1505_v38  ;;  %596 = vmatmul.bf16.vlgmr.msra.gmra.mxu1 %v176_v45 }
  0x23   :  { %640 = vmatpush.bf16.msrb.mxu1 %v1513_v39  ;;  %609 = vmatmul.bf16.vlgmr.msra.gmra.mxu2 %v177_v42 }
  0x24   :  { %653 = vmatpush.bf16.msrb.mxu2 %v1521_v40  ;;  %622 = vmatmul.bf16.vlgmr.msra.gmra.mxu3 %v178_v44 }
  0x25   :  { %666 = vmatpush.bf16.msrb.mxu3 %v1529_v41 }
  0x26   :  { %628 = vmatpush.bf16.msrb.mxu0 %v1504_v46 }
  0x27   :  { %641 = vmatpush.bf16.msrb.mxu1 %v1512_v47 }
  0x28   :  { %654 = vmatpush.bf16.msrb.mxu2 %v1520_v48 }
  0x29   :  { %667 = vmatpush.bf16.msrb.mxu3 %v1528_v49  ;;  %v1539_v49 = vld [vmem:[%s2019_s4 + $0x38] sm:$0xff] }
  0x2a   :  { %629 = vmatpush.bf16.msrb.mxu0 %v1503_v50  ;;  %v1538_v50 = vld [vmem:[%s2019_s4 + $0x30] sm:$0xff] }
  0x2b   :  { %642 = vmatpush.bf16.msrb.mxu1 %v1511_v51  ;;  %v1537_v51 = vld [vmem:[%s2019_s4 + $0x28] sm:$0xff] }
  0x2c   :  { %655 = vmatpush.bf16.msrb.mxu2 %v1519_v52  ;;  %v1536_v52 = vld [vmem:[%s2019_s4 + $0x20] sm:$0xff] }
  0x2d   :  { %668 = vmatpush.bf16.msrb.mxu3 %v1527_v53  ;;  %v1535_v53 = vld [vmem:[%s2019_s4 + $0x18] sm:$0xff] }
  0x2e   :  { %630 = vmatpush.bf16.msrb.mxu0 %v1502_v54  ;;  %v1534_v54 = vld [vmem:[%s2019_s4 + $0x10] sm:$0xff] }
  0x2f   :  { %643 = vmatpush.bf16.msrb.mxu1 %v1510_v55  ;;  %v1533_v55 = vld [vmem:[%s2019_s4 + $0x8] sm:$0xff] }
  0x30   :  { %656 = vmatpush.bf16.msrb.mxu2 %v1518_v56  ;;  %v1557_v56 = vld [vmem:[%s2016_s6 + $0x1] ss:$0 sm:$0xff] }
  0x31   :  { %669 = vmatpush.bf16.msrb.mxu3 %v1526_v57  ;;  %v1532_v57 = vld [vmem:[%s2019_s4] sm:$0xff] }
  0x32   :  { %631 = vmatpush.bf16.msrb.mxu0 %v1501_v58 }
  0x33   :  { %644 = vmatpush.bf16.msrb.mxu1 %v1509_v59 }
  0x34   :  { %657 = vmatpush.bf16.msrb.mxu2 %v1517_v60 }
  0x35   :  { %670 = vmatpush.bf16.msrb.mxu3 %v1525_v61 }
  0x36   :  { %632 = vmatpush.bf16.msrb.mxu0 %v1500_v62  ;;  %v1428_v62 = vld [vmem:[%s2020_s5 + $0x40] sm:$0xf] }
  0x37   :  { %645 = vmatpush.bf16.msrb.mxu1 %v1508_v63  ;;  %v1552_v63 = vld [vmem:[%s2020_s5 + $0x5c] sm:$0xf0] }
  0x38   :  { %658 = vmatpush.bf16.msrb.mxu2 %v1516_v0  ;;  %v1429_v0 = vor.u32 %v1552_v63, %v1428_v62  ;;  %v1558_v62 = vld [vmem:[%s2016_s6 + $0x2] ss:$0 sm:$0xff] }
  0x39   :  { %671 = vmatpush.bf16.msrb.mxu3 %v1524_v1  ;;  %v1396_v1 = vld [vmem:[%s2020_s5] sm:$0xf] }
  0x3a   :  { %633 = vmatpush.bf16.msrb.mxu0 %v1499_v2  ;;  %v1544_v2 = vld [vmem:[%s2020_s5 + $0x1c] sm:$0xf0] }
  0x3b   :  { %646 = vmatpush.bf16.msrb.mxu1 %v1507_v3 }
  0x3c   :  { %659 = vmatpush.bf16.msrb.mxu2 %v1515_v5  ;;  %v1397_v5 = vor.u32 %v1544_v2, %v1396_v1  ;;  %v1551_v1 = vld [vmem:[%s2020_s5 + $0x5c] sm:$0xf] }
  0x3d   :  { %672 = vmatpush.bf16.msrb.mxu3 %v1523_v6  ;;  %v1454_v2 = vld [vmem:[%s2020_s5 + $0x78] sm:$0xf0] }
  0x3e   :  { %634 = vmatpush.bf16.msrb.mxu0 %v1498_v10 }
  0x3f   :  { %647 = vmatpush.bf16.msrb.mxu1 %v1506_v11  ;;  %v717_v11 = vand.u32 127, %v716_v9 }
  0x40   :  { %660 = vmatpush.bf16.msrb.mxu2 %v1514_v14 }
  0x41   :  { %673 = vmatpush.bf16.msrb.mxu3 %v1522_v15  ;;  %635 = vmatmul.bf16.vlgmr.msrb.gmra.mxu0 %v179_v16  ;;  %vm719_vm1 = vcmp.ge.s32.totalorder %v717_v11, 16  ;;  %vm720_vm2 = vcmp.lt.s32.totalorder %v717_v11, 32  ;;  %vm718_vm5 = vcmp.lt.s32.totalorder %v717_v11, 16 }
  0x42   :  { %648 = vmatmul.bf16.vlgmr.msrb.gmra.mxu1 %v180_v17  ;;  %709 = vmatpush.bf16.msra.mxu0 %v1531_v20  ;;  %vm721_vm4 = vmand %vm719_vm1, %vm720_vm2 }
  0x43   :  { %661 = vmatmul.bf16.vlgmr.msrb.gmra.mxu2 %v181_v18  ;;  %811 = vmatpush.bf16.msra.mxu1 %v1539_v49  ;;  %v1444_v49 = vld [vmem:[%s2020_s5 + $0x50] sm:$0xf] }
  0x44   :  { %674 = vmatmul.bf16.vlgmr.msrb.gmra.mxu3 %v182_v19  ;;  %950 = vmatpush.bf16.msra.mxu2 %v1429_v0  ;;  %v741_v19 = vld [vmem:[%s2021_s1] sm:$0xff] }
  0x46   :  { %710 = vmatpush.bf16.msra.mxu0 %v1530_v26  ;;  %v1548_v26 = vld [vmem:[%s2020_s5 + $0x44] sm:$0xf] }
  0x47   :  { %812 = vmatpush.bf16.msra.mxu1 %v1538_v50  ;;  %v1554_v50 = vld [vmem:[%s2020_s5 + $0x6c] sm:$0xf0] }
  0x48   :  { %951 = vmatpush.bf16.msra.mxu2 %v1397_v5  ;;  %v1457_v5 = vor.u32 %v1551_v1, %v1454_v2 }
  0x4b   :  { %813 = vmatpush.bf16.msra.mxu1 %v1537_v51  ;;  %v1445_v51 = vor.u32 %v1554_v50, %v1444_v49 }
  0x4f   :  { %814 = vmatpush.bf16.msra.mxu1 %v1536_v52  ;;  %v1550_v52 = vld [vmem:[%s2020_s5 + $0x54] sm:$0xf] }
  0x53   :  { %815 = vmatpush.bf16.msra.mxu1 %v1535_v53  ;;  %v1446_v53 = vld [vmem:[%s2020_s5 + $0x70] sm:$0xf0] }
  0x57   :  { %816 = vmatpush.bf16.msra.mxu1 %v1534_v54  ;;  %v1412_v54 = vld [vmem:[%s2020_s5 + $0x10] sm:$0xf] }
  0x5b   :  { %817 = vmatpush.bf16.msra.mxu1 %v1533_v55 }
  0x5f   :  { %818 = vmatpush.bf16.msra.mxu1 %v1532_v57  ;;  %v1546_v57 = vld [vmem:[%s2020_s5 + $0x2c] sm:$0xf0] }
  0x9e   :  { %v584_v21 = vpop.f32.mrf.mxu0 }
  0x9f   :  { %v597_v22 = vpop.f32.mrf.mxu1  ;;  %v585_v31 = vadd.f32 %v1556_v28, %v584_v21  ;;  %v1436_v28 = vld [vmem:[%s2020_s5 + $0x48] sm:$0xf] }
  0xa1   :  { %v598_v32 = vadd.f32 %v597_v22, %v585_v31  ;;  %v1452_v31 = vld [vmem:[%s2020_s5 + $0x58] sm:$0xf] }
  0xa6   :  { %v610_v23 = vpop.f32.mrf.mxu2  ;;  %v586_v25 = vpop.f32.mrf.mxu0 }
  0xa7   :  { %v623_v24 = vpop.f32.mrf.mxu3  ;;  %v599_v27 = vpop.f32.mrf.mxu1  ;;  %v611_v33 = vadd.f32 %v610_v23, %v598_v32  ;;  %v1555_v32 = vld [vmem:[%s2020_s5 + $0x74] sm:$0xf0] }
  0xa8   :  { %v1430_v27 = vld [vmem:[%s2020_s5 + $0x60] sm:$0xf0] }
  0xa9   :  { %v624_v34 = vadd.f32 %v623_v24, %v611_v33 }
  0xae   :  { %v612_v29 = vpop.f32.mrf.mxu2 }
  0xaf   :  { %v625_v30 = vpop.f32.mrf.mxu3  ;;  %v1433_v29 = vor.u32 %v1548_v26, %v1430_v27 }
  0xb0   :  { %v1553_v30 = vld [vmem:[%s2020_s5 + $0x64] sm:$0xf0] }
  0xb1   :  { %v1437_v33 = vor.u32 %v1553_v30, %v1436_v28  ;;  %963 = vmatpush.bf16.msra.mxu3 %v1433_v29 }
  0xb3   :  { %976 = vmatpush.bf16.msrb.mxu0 %v1437_v33 }
  0xbe   :  { %v636_v35 = vpop.f32.mrf.mxu0 }
  0xbf   :  { %v649_v36 = vpop.f32.mrf.mxu1  ;;  %v637_v37 = vadd.f32 %v636_v35, %v624_v34  ;;  %v1453_v34 = vor.u32 %v1555_v32, %v1452_v31  ;;  %v1540_v35 = vld [vmem:[%s2020_s5 + $0x4] sm:$0xf] }
  0xc1   :  { %v650_v38 = vadd.f32 %v649_v36, %v637_v37  ;;  %1028 = vmatpush.bf16.msrb.mxu1 %v1453_v34  ;;  %v1398_v36 = vld [vmem:[%s2020_s5 + $0x20] sm:$0xf0]  ;;  %v1404_v37 = vld [vmem:[%s2020_s5 + $0x8] sm:$0xf] }
  0xc6   :  { %v662_v39 = vpop.f32.mrf.mxu2  ;;  %v638_v42 = vpop.f32.mrf.mxu0 }
  0xc7   :  { %v675_v40 = vpop.f32.mrf.mxu3  ;;  %v663_v41 = vadd.f32 %v662_v39, %v650_v38  ;;  %v651_v43 = vpop.f32.mrf.mxu1  ;;  %v1401_v38 = vor.u32 %v1540_v35, %v1398_v36  ;;  %v1545_v39 = vld [vmem:[%s2020_s5 + $0x24] sm:$0xf0] }
  0xc8   :  { %v1405_v42 = vor.u32 %v1545_v39, %v1404_v37 }
  0xc9   :  { %v676_v44 = vadd.f32 %v675_v40, %v663_v41  ;;  %v1420_v40 = vld [vmem:[%s2020_s5 + $0x18] sm:$0xf]  ;;  %964 = vmatpush.bf16.msra.mxu3 %v1401_v38 }
  0xca   :  { %v1547_v41 = vld [vmem:[%s2020_s5 + $0x34] sm:$0xf0]  ;;  %977 = vmatpush.bf16.msrb.mxu0 %v1405_v42 }
  0xcb   :  { %v679_v45 = vmax.f32 %v676_v44, 0.0  ;;  %v1421_v43 = vor.u32 %v1547_v41, %v1420_v40  ;;  %v1549_v44 = vld [vmem:[%s2020_s5 + $0x4c] sm:$0xf] }
  0xcd   :  { %v681_v46 = vpack.c.bf16 %v679_v45, %v679_v45  ;;  %1029 = vmatpush.bf16.msrb.mxu1 %v1421_v43  ;;  %v1438_v45 = vld [vmem:[%s2020_s5 + $0x68] sm:$0xf0]  ;;  %1002 = vmatpush.bf16.msrb.mxu3 %v1445_v51 }
  0xce   :  { %v664_v47 = vpop.f32.mrf.mxu2 }
  0xcf   :  { %v677_v48 = vpop.f32.mrf.mxu3  ;;  %1360 = vmatmul.msk.bf16.vlgmr.msra.gmra.mxu0 %vm699_vm0, %v681_v46  ;;  %v1541_v46 = vld [vmem:[%s2020_s5 + $0xc] sm:$0xf]  ;;  %v1441_v47 = vor.u32 %v1549_v44, %v1438_v45 }
  0xd0   :  { %v1406_v48 = vld [vmem:[%s2020_s5 + $0x28] sm:$0xf0] }
  0xd1   :  { %989 = vmatpush.bf16.msrb.mxu2 %v1441_v47  ;;  %v1409_v55 = vor.u32 %v1541_v46, %v1406_v48 }
  0xd5   :  { %990 = vmatpush.bf16.msrb.mxu2 %v1409_v55 }
 0x14c   :  { %v712_v58 = vpop.f32.mrf.mxu0 }
 0x14d   :  { %v713_v59 = vadd.f32 %v1557_v56, %v712_v58  ;;  %v1449_v56 = vor.u32 %v1550_v52, %v1446_v53  ;;  %v1542_v58 = vld [vmem:[%s2020_s5 + $0x14] sm:$0xf] }
 0x14f   :  { %v723_v60 = vand.u32 2147483647, %v713_v59  ;;  %v722_v16 = vmax.f32 %v713_v59, 0.0  ;;  %v739_v23 = vsel %vm718_vm5, %v713_v59, 0.0  ;;  %1015 = vmatpush.bf16.msra.mxu0 %v1449_v56 }
 0x151   :  { %v724_v61 = vsub.f32 0.0, %v723_v60  ;;  %v1413_v60 = vor.u32 %v1546_v57, %v1412_v54 }
 0x153   :  { %v725_v3 = vmul.f32 1.442695, %v724_v61  ;;  %1003 = vmatpush.bf16.msrb.mxu3 %v1413_v60 }
 0x154   :  { %v714_v4 = vpop.f32.mrf.mxu0 }
 0x155   :  { %1559 = vpow2.f32 %v725_v3 }
 0x15b   :  { %v1560_v6 = vpop.eup %1559 }
 0x15c   :  { %v727_v7 = vadd.f32 1.0, %v1560_v6  ;;  %v730_v8 = vmul.f32 -0.5, %v1560_v6  ;;  %v733_v12 = vand.u32 2147483647, %v1560_v6 }
 0x15e   :  { %1561 = vlog2.f32 %v727_v7  ;;  %v731_v10 = vadd.f32 1.0, %v730_v8  ;;  %vm734_vm3 = vcmp.lt.f32.partialorder %v733_v12, 0.0004427343  ;;  %v1422_v7 = vld [vmem:[%s2020_s5 + $0x38] sm:$0xf0] }
 0x160   :  { %v732_v15 = vmul.f32 %v1560_v6, %v731_v10  ;;  %v1543_v6 = vld [vmem:[%s2020_s5 + $0x1c] sm:$0xf] }
 0x161   :  { %v1425_v9 = vor.u32 %v1543_v6, %v1422_v7  ;;  %v1981_v10 = vld [vmem:[%s2016_s6 + $0x3] ss:$4 sm:$0xff] }
 0x162   :  { %v847_v11 = vperm.slane %v1981_v10, 2  ;;  %v851_v12 = vperm.slane %v1981_v10, 6  ;;  %v850_v35 = vperm.slane %v1981_v10, 5  ;;  %v848_v44 = vperm.slane %v1981_v10, 3 }
 0x163   :  { %v849_v45 = vperm.slane %v1981_v10, 4  ;;  %v852_v1 = vperm.slane %v1981_v10, 7 }
 0x164   :  { %v1562_v13 = vpop.eup %1561 }
 0x165   :  { %v729_v14 = vmul.f32 0.6931472, %v1562_v13 }
 0x167   :  { %v735_v17 = vsel %vm734_vm3, %v732_v15, %v729_v14 }
 0x168   :  { %v736_v18 = vadd.f32 %v735_v17, %v722_v16  ;;  %v845_v17 = vperm.slane %v1981_v10, 0 }
 0x16a   :  { %v737_v20 = vsel %vm721_vm4, %v736_v18, %v713_v59  ;;  %v740_v21 = vsel %vm721_vm4, %v736_v18, 0.0  ;;  %v1414_v59 = vld [vmem:[%s2020_s5 + $0x30] sm:$0xf0]  ;;  %v846_v18 = vperm.slane %v1981_v10, 1 }
 0x16b   :  { %738 = vst [vmem:[%s2022_s8] sm:$0xff] %v737_v20  ;;  %v742_v22 = vmul.f32 %v741_v19, %v740_v21  ;;  %v1417_v61 = vor.u32 %v1542_v58, %v1414_v59 }
 0x16d   :  { %v743_v24 = vadd.f32 %v742_v22, %v739_v23  ;;  %1016 = vmatpush.bf16.msra.mxu0 %v1417_v61 }
 0x16f   :  { %v745_v25 = vpack.c.bf16 %v743_v24, %v743_v24 }
 0x171   :  { %819 = vmatmul.bf16.vlgmr.msra.gmra.mxu1 %v745_v25 }
 0x1ee   :  { %v820_v63 = vpop.f32.mrf.mxu1 }
 0x1ef   :  { %v821_v0 = vadd.f32 %v1558_v62, %v820_v63 }
 0x1f1   :  { %v824_v3 = vmax.f32 %v821_v0, 0.0 }
 0x1f3   :  { %v827_v4 = vpack.c.bf16 %v824_v3, %v824_v3 }
 0x1f5   :  { %1458 = vmatmul.msk.bf16.vlgmr.msra.gmra.mxu2 %vm699_vm0, %v827_v4  ;;  %1459 = vmatmul.msk.bf16.vlgmr.msra.gmra.mxu3 %vm699_vm0, %v827_v4 }
 0x1f6   :  { %1460 = vmatmul.msk.bf16.vlgmr.msrb.gmra.mxu0 %vm699_vm0, %v827_v4  ;;  %1464 = vmatmul.msk.bf16.vlgmr.msrb.gmra.mxu1 %vm699_vm0, %v827_v4  ;;  %v822_v8 = vpop.f32.mrf.mxu1 }
 0x1f7   :  { %1041 = vmatpush.bf16.msra.mxu2 %v1457_v5 }
 0x1fb   :  { %1042 = vmatpush.bf16.msra.mxu2 %v1425_v9 }
 0x205   :  { %1461 = vmatmul.msk.bf16.vlgmr.msrb.gmra.mxu2 %vm699_vm0, %v827_v4  ;;  %1462 = vmatmul.msk.bf16.vlgmr.msrb.gmra.mxu3 %vm699_vm0, %v827_v4 }
 0x206   :  { %1463 = vmatmul.msk.bf16.vlgmr.msra.gmra.mxu0 %vm699_vm0, %v827_v4 }
 0x215   :  { %1465 = vmatmul.msk.bf16.vlgmr.msra.gmra.mxu2 %vm699_vm0, %v827_v4 }
 0x273   :  { %v979_v13 = vpop.f32.mrf.mxu0  ;;  %v1031_v14 = vpop.f32.mrf.mxu1 }
 0x274   :  { %v980_v15 = vadd.f32 %v979_v13, %v847_v11  ;;  %v1032_v16 = vadd.f32 %v1031_v14, %v851_v12 }
 0x276   :  { %v1050_v19 = vmul.f32 0.5, %v980_v15  ;;  %v1054_v20 = vmul.f32 0.5, %v1032_v16 }
 0x278   :  { %1563 = vtanh.f32 %v1050_v19  ;;  %v953_v21 = vpop.f32.mrf.mxu2  ;;  %v966_v22 = vpop.f32.mrf.mxu3 }
 0x279   :  { %1565 = vtanh.f32 %v1054_v20  ;;  %v954_v23 = vadd.f32 %v953_v21, %v845_v17  ;;  %v967_v24 = vadd.f32 %v966_v22, %v846_v18 }
 0x27b   :  { %v1048_v25 = vmul.f32 0.5, %v954_v23  ;;  %v1049_v26 = vmul.f32 0.5, %v967_v24  ;;  %v981_v27 = vpop.f32.mrf.mxu0  ;;  %v1033_v28 = vpop.f32.mrf.mxu1 }
 0x27d   :  { %1567 = vtanh.f32 %v1048_v25 }
 0x27e   :  { %v1564_v29 = vpop.eup %1563  ;;  %1569 = vtanh.f32 %v1049_v26 }
 0x27f   :  { %v1566_v30 = vpop.eup %1565  ;;  %v1066_v31 = vmul.f32 0.5, %v1564_v29 }
 0x280   :  { %v1070_v32 = vmul.f32 0.5, %v1566_v30  ;;  %v955_v33 = vpop.f32.mrf.mxu2  ;;  %v968_v34 = vpop.f32.mrf.mxu3 }
 0x281   :  { %v1074_v36 = vadd.f32 0.5, %v1066_v31 }
 0x282   :  { %v1078_v37 = vadd.f32 0.5, %v1070_v32 }
 0x283   :  { %v1568_v38 = vpop.eup %1567  ;;  %1082 = vst [vmem:[%s2023_s7 + $0x10] sm:$0xff] %v1074_v36  ;;  %v1018_v39 = vpop.f32.mrf.mxu0 }
 0x284   :  { %v1570_v40 = vpop.eup %1569  ;;  %1086 = vst [vmem:[%s2023_s7 + $0x30] sm:$0xff] %v1078_v37  ;;  %v1064_v41 = vmul.f32 0.5, %v1568_v38  ;;  %v1019_v42 = vadd.f32 %v1018_v39, %v850_v35 }
 0x285   :  { %v1065_v43 = vmul.f32 0.5, %v1570_v40 }
 0x286   :  { %v1072_v46 = vadd.f32 0.5, %v1064_v41  ;;  %v1053_v47 = vmul.f32 0.5, %v1019_v42 }
 0x287   :  { %v1073_v48 = vadd.f32 0.5, %v1065_v43 }
 0x288   :  { %1080 = vst [vmem:[%s2023_s7] sm:$0xff] %v1072_v46  ;;  %1571 = vtanh.f32 %v1053_v47  ;;  %v992_v49 = vpop.f32.mrf.mxu2  ;;  %v1005_v50 = vpop.f32.mrf.mxu3 }
 0x289   :  { %1081 = vst [vmem:[%s2023_s7 + $0x8] sm:$0xff] %v1073_v48  ;;  %v993_v51 = vadd.f32 %v992_v49, %v848_v44  ;;  %v1006_v52 = vadd.f32 %v1005_v50, %v849_v45 }
 0x28b   :  { %v1051_v53 = vmul.f32 0.5, %v993_v51  ;;  %v1052_v54 = vmul.f32 0.5, %v1006_v52  ;;  %v1020_v55 = vpop.f32.mrf.mxu0 }
 0x28d   :  { %1573 = vtanh.f32 %v1051_v53 }
 0x28e   :  { %v1572_v56 = vpop.eup %1571  ;;  %1575 = vtanh.f32 %v1052_v54 }
 0x28f   :  { %v1069_v57 = vmul.f32 0.5, %v1572_v56 }
 0x290   :  { %v994_v58 = vpop.f32.mrf.mxu2  ;;  %v1007_v59 = vpop.f32.mrf.mxu3 }
 0x291   :  { %v1077_v60 = vadd.f32 0.5, %v1069_v57 }
 0x293   :  { %v1574_v61 = vpop.eup %1573  ;;  %1085 = vst [vmem:[%s2023_s7 + $0x28] sm:$0xff] %v1077_v60 }
 0x294   :  { %v1576_v62 = vpop.eup %1575  ;;  %v1067_v63 = vmul.f32 0.5, %v1574_v61 }
 0x295   :  { %v1068_v0 = vmul.f32 0.5, %v1576_v62 }
 0x296   :  { %v1075_v2 = vadd.f32 0.5, %v1067_v63 }
 0x297   :  { %v1076_v3 = vadd.f32 0.5, %v1068_v0 }
 0x298   :  { %1083 = vst [vmem:[%s2023_s7 + $0x18] sm:$0xff] %v1075_v2  ;;  %v1044_v4 = vpop.f32.mrf.mxu2 }
 0x299   :  { %1084 = vst [vmem:[%s2023_s7 + $0x20] sm:$0xff] %v1076_v3  ;;  %v1045_v5 = vadd.f32 %v1044_v4, %v852_v1 }
 0x29b   :  { %v1055_v6 = vmul.f32 0.5, %v1045_v5 }
 0x29d   :  { %1577 = vtanh.f32 %v1055_v6 }
 0x2a0   :  { %v1046_v7 = vpop.f32.mrf.mxu2 }
 0x2a3   :  { %v1578_v8 = vpop.eup %1577 }
 0x2a4   :  { %v1071_v9 = vmul.f32 0.5, %v1578_v8 }
 0x2a6   :  { %v1079_v11 = vadd.f32 0.5, %v1071_v9 }
 0x2a8   :  { %1087 = vst [vmem:[%s2023_s7 + $0x38] sm:$0xff] %v1079_v11 }

</bundles_post_ra>
